<compile_context>
chip_gen: v7x
topology: tpu7x:2x2x1
jax: 0.10.0
libtpu: 0.0.40
codegen_flags: <defaults>
</compile_context>

<pallas_src>
import math
from functools import partial

import jax
import jax.numpy as jnp
from jax import lax
from jax.experimental import pallas as pl
from jax.experimental.pallas import tpu as pltpu


def _round_up(x, m):
    return ((x + m - 1) // m) * m


# ----------------------------------------------------------------------------------------
# Kernels
# ----------------------------------------------------------------------------------------
def _pe_kernel(tab_ref, o_ref):
    """3-D path: o_ref is one (1, TL, D) tile; tab_ref is the resident (2, D) column table
    (row 0 = inv_freq[j], row 1 = phase[j] = (j & 1) * pi/2 so odd columns become cos)."""
    TL, D = o_ref.shape[1], o_ref.shape[2]
    base = (pl.program_id(0) * TL).astype(jnp.float32)
    # row index per element, generated directly in f32 (saves a (TL, D) int->f32 convert)
    pos = base + lax.broadcasted_iota(jnp.float32, (TL, D), 0)
    # single EUP transcendental per element: sin(p * w_j + phase_j)
    o_ref[0] = jnp.sin(pos * tab_ref[0:1, :] + tab_ref[1:2, :]).astype(o_ref.dtype)


def _pe_flat_kernel(tab_ref, o_ref, *, tile_rows):
    """Flattened path (lane-dense stores when d_model % 128 != 0).

    o_ref is one (1, TL*D) tile of the row-major-flattened table.  tab_ref holds the
    resident per-element affine coefficients so that angle = base * freq + bias, with
    base = first position of this tile, freq = inv_freq[col], bias = row_off*freq + phase.
    """
    base = (pl.program_id(0) * tile_rows).astype(jnp.float32)
    o_ref[...] = jnp.sin(base * tab_ref[0:1, :] + tab_ref[1:2, :]).astype(o_ref.dtype)


# ----------------------------------------------------------------------------------------
# Wrapper
# ----------------------------------------------------------------------------------------
def positional_embedding(x, d_model, max_len=5000):
    """Matches PositionalEmbedding.forward: returns (1, L, d_model) float32, L = x.shape[1]."""
    L = x.shape[1]
    assert L <= max_len, "sequence length exceeds max_len"

    # Per-column frequency / phase.  Column j pairs with div_term[j // 2]; odd columns are
    # cos, expressed as sin(angle + pi/2) so the kernel needs a single transcendental.
    col = jnp.arange(d_model, dtype=jnp.float32)
    inv_freq = jnp.exp((col // 2.0) * 2.0 * (-(math.log(10000.0) / d_model)))
    phase = (jnp.arange(d_model) % 2).astype(jnp.float32) * (math.pi / 2.0)

    # ---- L-tile selection --------------------------------------------------------------
    #  * multiple of 8 (sublane rule) unless the block covers all of L,
    #  * at least 2 grid steps when L > 8 so "parallel" shards across v7x's two TCs,
    #  * single output block <= ~8 MiB so the double-buffered pipeline stays far below
    #    every chip's VMEM budget (v7x has only 64 MiB per TC).
    bytes_per_row = d_model * 4
    vmem_rows = max(8, ((8 * 1024 * 1024) // bytes_per_row) // 8 * 8)
    tl_cap = min(2048, vmem_rows)
    if L <= 8:
        tl = L
    else:
        tl = min(tl_cap, _round_up(pl.cdiv(L, 2), 8))
    grid = (pl.cdiv(L, tl),)

    compiler_params = pltpu.CompilerParams(
        dimension_semantics=("parallel",),
        vmem_limit_bytes=48 * 1024 * 1024,
    )

    flat = tl * d_model
    lane_dense_3d = (d_model % 128 == 0)
    use_flat = (not lane_dense_3d) and (flat % 128 == 0 or grid[0] == 1)

    if not use_flat:
        # Production case: d_model a multiple of 128 -> full, lane-dense last dim.
        # (If d_model is neither a multiple of 128 nor flatten-able we still land here;
        #  stores become masked but the kernel stays correct.)
        tab = jnp.stack([inv_freq, phase], axis=0)                        # (2, d_model)
        return pl.pallas_call(
            _pe_kernel,
            out_shape=jax.ShapeDtypeStruct((1, L, d_model), jnp.float32),
            grid_spec=pltpu.PrefetchScalarGridSpec(
                num_scalar_prefetch=0,
                grid=grid,
                in_specs=[pl.BlockSpec((2, d_model), lambda i: (0, 0))],   # resident
                out_specs=pl.BlockSpec((1, tl, d_model), lambda i: (0, i, 0)),
            ),
            compiler_params=compiler_params,
        )(tab)

    # Small / odd d_model: flatten to (1, L*d_model) so the store path is lane dense.
    rows = jnp.arange(tl, dtype=jnp.float32)
    freq_flat = jnp.tile(inv_freq, tl)                                    # (tl*d_model,)
    bias_flat = jnp.repeat(rows, d_model) * freq_flat + jnp.tile(phase, tl)
    tab = jnp.stack([freq_flat, bias_flat], axis=0)                       # (2, tl*d_model)
    out_flat = pl.pallas_call(
        partial(_pe_flat_kernel, tile_rows=tl),
        out_shape=jax.ShapeDtypeStruct((1, L * d_model), jnp.float32),
        grid_spec=pltpu.PrefetchScalarGridSpec(
            num_scalar_prefetch=0,
            grid=grid,
            in_specs=[pl.BlockSpec((2, flat), lambda i: (0, 0))],          # resident
            out_specs=pl.BlockSpec((1, flat), lambda i: (0, i)),
        ),
        compiler_params=compiler_params,
    )(tab)
    return out_flat.reshape(1, L, d_model)


# ----------------------------------------------------------------------------------------
# Reference + smoke test
# ----------------------------------------------------------------------------------------
def _reference(L, d_model):
    # pure-JAX replica of the PyTorch buffer construction, sliced to L
    position = jnp.arange(L, dtype=jnp.float32)[:, None]
    div_term = jnp.exp(
        jnp.arange(0, d_model, 2, dtype=jnp.float32) * -(math.log(10000.0) / d_model)
    )
    pe = jnp.zeros((L, d_model), jnp.float32)
    pe = pe.at[:, 0::2].set(jnp.sin(position * div_term))
    pe = pe.at[:, 1::2].set(jnp.cos(position * div_term))
    return pe[None]


if __name__ == "__main__":
    key = jax.random.PRNGKey(0)

    # Shapes implied by the module's usage inside DataEmbedding: x is (B, L, c_in);
    # forward only reads x.shape[1].
    B, L, c_in, d_model = 2, 8, 4, 32
    x = jax.random.normal(key, (B, L, c_in), dtype=jnp.float32)

    out = jax.block_until_ready(positional_embedding(x, d_model))
    assert out.shape == (1, L, d_model) and out.dtype == jnp.float32
    assert jnp.allclose(out, _reference(L, d_model), atol=1e-5, rtol=1e-5), "flat path mismatch"

    # Also exercise the lane-dense 3-D path (d_model multiple of 128, multi-step grid).
    L2, d2 = 16, 128
    x2 = jax.random.normal(key, (B, L2, c_in), dtype=jnp.float32)
    out2 = jax.block_until_ready(positional_embedding(x2, d2))
    assert jnp.allclose(out2, _reference(L2, d2), atol=1e-5, rtol=1e-5), "3d path mismatch"

    print("KERNEL_OK")
</pallas_src>

<mosaic_0001>
module attributes {stable_mosaic.version = 11 : i64} {
  func.func @_pe_flat_kernel(%arg0: i32, %arg1: memref<2x256xf32, #tpu.memory_space<vmem>>, %arg2: memref<1x256xf32, #tpu.memory_space<vmem>>) attributes {dimension_semantics = [#tpu.dimension_semantics<parallel>], iteration_bounds = array<i64: 1>, scalar_prefetch = 0 : i64, scratch_operands = 0 : i64, tpu.core_type = #tpu.core_type<tc>, window_params = [{pipeline_mode = #tpu.pipeline_mode<synchronous>, transform_indices = @transform_0, window_bounds = array<i64: 2, 256>}, {transform_indices = @transform_1, window_bounds = array<i64: 1, 256>}]} {
    %c8_i32 = arith.constant 8 : i32
    %0 = arith.muli %arg0, %c8_i32 : i32
    %1 = arith.sitofp %0 : i32 to f32
    %c0 = arith.constant 0 : index
    %c0_0 = arith.constant 0 : index
    %2 = vector.load %arg1[%c0, %c0_0] : memref<2x256xf32, #tpu.memory_space<vmem>>, vector<1x256xf32>
    %3 = vector.broadcast %1 : f32 to vector<1x256xf32>
    %4 = arith.mulf %3, %2 : vector<1x256xf32>
    %c1 = arith.constant 1 : index
    %c0_1 = arith.constant 0 : index
    %5 = vector.load %arg1[%c1, %c0_1] : memref<2x256xf32, #tpu.memory_space<vmem>>, vector<1x256xf32>
    %6 = arith.addf %4, %5 : vector<1x256xf32>
    %7 = math.sin %6 : vector<1x256xf32>
    %c0_2 = arith.constant 0 : index
    %c0_3 = arith.constant 0 : index
    %8 = vector.load %arg2[%c0_2, %c0_3] : memref<1x256xf32, #tpu.memory_space<vmem>>, vector<1x256xf32>
    tpu.vector_store %arg2[%c0_2, %c0_3], %7 {strides = array<i32>} : memref<1x256xf32, #tpu.memory_space<vmem>>, vector<1x256xf32>,
    return
  }
  func.func @transform_0(%arg0: i32) -> (i32, i32) {
    %c0_i32 = arith.constant 0 : i32
    %c0_i32_0 = arith.constant 0 : i32
    %c0_i32_1 = arith.constant 0 : i32
    return %c0_i32, %c0_i32_0 : i32, i32
  }
  func.func @transform_1(%arg0: i32) -> (i32, i32) {
    %c0_i32 = arith.constant 0 : i32
    %c0_i32_0 = arith.constant 0 : i32
    return %c0_i32, %arg0 : i32, i32
  }
}

</mosaic_0001>

<bundles_post_ra>
// kernel: tpu_custom_call.1
= control target key start
LH: loop header
LB: loop body
LE: loop exit
PB: predicated region body
PF: predicated region fallthrough
CT: control target
= control target key end

     0   :  { %6 = vsyncpa [#allocation3], 0  ;;  %s284_s0 = inlined_call_operand.hbm [shape: f32[2,256], index: 0, kind: input, shape index: {}]   ;;  %s285_s1 = inlined_call_operand.hbm [shape: f32[1,256], index: 1, kind: output, shape index: {}]  }
   0x1   :  { %7 = vsyncpa [#allocation4], 0  ;;  %s221_s6 = smov [#allocation2]   ;;  %s173_s10 = scalar_lea.hbm %s284_s0, 64 }
   0x2   :  { %s14_s7 = sshll.u32 %s221_s6, 4  ;;  %p174_p0 = scmp.ne.s32.totalorder %s284_s0, %s173_s10  ;;  %s15_s7 = int_to_ptr.vmem [resolvable:$true] %s14_s7 }
   0x3   :  { %p177_p1 = scmp.lt.u32.totalorder %s173_s10, %s284_s0 }
   0x5   :  { %p179_p2 = pnand %p177_p1, %p174_p0 }
   0x7   :  { %182 = shalt.err (!%p179_p2)
}
   0x8   :  { %s183_s15 = scalar_lea.vmem %s15_s7, 64  ;;  %p188_p4 = scmp.lt.s32.totalorder %s15_s7, %s15_s7 }
   0x9   :  { %p184_p3 = scmp.ne.s32.totalorder %s15_s7, %s183_s15  ;;  %p189_p5 = scmp.lt.s32.totalorder %s183_s15, %s183_s15 }
   0xb   :  { %p190_p6 = por %p189_p5, %p188_p4 }
   0xd   :  { %p191_p7 = pnand %p190_p6, %p184_p3 }
   0xf   :  { %194 = shalt.err (!%p191_p7)
}
  0x10   :  { %17 = dma.hbm_to_vmem [thread:$0]  %s284_s0, 64, %s15_s7, [#allocation3]  }
  0x11   :  { %217 = dma.done.wait [#allocation3], 64  }
  0x12   :  { %218 = vsyncadd [#allocation3], 4294967232  ;;  %v23_v0 = vld [vmem:[#allocation2] ss:$2 sm:$0x3]  ;;  %s228_s0 = smov [#allocation5]  }
  0x13   :  { %v27_v1 = vld [vmem:[#allocation2 + $0x1] ss:$2 sm:$0x3]  ;;  %v25_v2 = vmul.f32 0.0, %v23_v0  ;;  %v222_v15 = vmov 683565275  }
  0x14   :  { %v223_v17 = vmov 2475754826   ;;  %v224_v19 = vmov 2131351028   ;;  %v225_v21 = vmov 2102212464  }
  0x15   :  { %v251_v3 = vadd.f32 %v27_v1, %v25_v2  ;;  %v226_v23 = vmov 920167782   ;;  %v227_v30 = vmov 1326507024   ;;  %s144_s18 = sshll.u32 %s228_s0, 4  ;;  %s145_s18 = int_to_ptr.vmem [resolvable:$true] %s144_s18 }
  0x16   :  { %s195_s19 = scalar_lea.vmem %s145_s18, 32  ;;  %p200_p9 = scmp.lt.s32.totalorder %s145_s18, %s145_s18 }
  0x17   :  { %v32_v4 = vand.u32 2139095040, %v251_v3  ;;  %v29_v6 = vand.u32 2147483647, %v251_v3  ;;  %vm31_vm7 = vcmp.lt.s32.totalorder %v251_v3, 0  ;;  %vm121_vm12 = vweird.f32 %v251_v3  ;;  %p196_p8 = scmp.ne.s32.totalorder %s145_s18, %s195_s19  ;;  %p201_p10 = scmp.lt.s32.totalorder %s195_s19, %s195_s19 }
  0x19   :  { %v33_v5 = vshrl.u32 %v32_v4, 23  ;;  %v36_v9 = vand.u32 8388607, %v29_v6  ;;  %vm30_vm8 = vcmp.le.f32.partialorder %v29_v6, 0.7853982  ;;  %p202_p11 = por %p201_p10, %p200_p9 }
  0x1b   :  { %v153_v7 = vadd.s32 4294967169, %v33_v5  ;;  %v37_v12 = vor.u32 8388608, %v36_v9  ;;  %p203_p12 = pnand %p202_p11, %p196_p8 }
  0x1d   :  { %v39_v8 = vadd.s32 1, %v153_v7  ;;  %v77_v32 = vshll.u32 %v37_v12, 8 }
  0x1f   :  { %vm40_vm0 = vcmp.gt.s32.totalorder %v39_v8, 0 }
  0x20   :  { %v41_v10 = vsel %vm40_vm0, %v39_v8, 0 }
  0x21   :  { %v43_v11 = vand.u32 31, %v41_v10  ;;  %v42_v13 = vshrl.u32 %v41_v10, 5 }
  0x23   :  { %v44_v14 = vsub.s32 32, %v43_v11  ;;  %v46_v16 = vshll.u32 %v222_v15, %v43_v11  ;;  %v49_v18 = vshll.u32 %v223_v17, %v43_v11  ;;  %v52_v20 = vshll.u32 %v224_v19, %v43_v11 }
  0x24   :  { %v55_v22 = vshll.u32 %v225_v21, %v43_v11  ;;  %v58_v24 = vshll.u32 %v226_v23, %v43_v11  ;;  %vm61_vm1 = vcmp.lt.s32.totalorder %v42_v13, 1  ;;  %vm64_vm2 = vcmp.lt.s32.totalorder %v42_v13, 4 }
  0x25   :  { %v45_v25 = vshrl.u32 %v222_v15, %v44_v14  ;;  %v47_v26 = vshrl.u32 %v223_v17, %v44_v14  ;;  %v50_v27 = vshrl.u32 %v224_v19, %v44_v14  ;;  %v53_v28 = vshrl.u32 %v225_v21, %v44_v14 }
  0x26   :  { %v56_v29 = vshrl.u32 %v226_v23, %v44_v14  ;;  %v59_v31 = vshrl.u32 %v227_v30, %v44_v14  ;;  %vm62_vm3 = vcmp.lt.s32.totalorder %v42_v13, 2  ;;  %vm63_vm4 = vcmp.lt.s32.totalorder %v42_v13, 3 }
  0x27   :  { %v48_v33 = vor.u32 %v47_v26, %v46_v16  ;;  %v51_v34 = vor.u32 %v50_v27, %v49_v18  ;;  %v54_v35 = vor.u32 %v53_v28, %v52_v20  ;;  %v133_v26 = vlaneseq }
  0x28   :  { %v57_v36 = vor.u32 %v56_v29, %v55_v22  ;;  %v60_v37 = vor.u32 %v59_v31, %v58_v24 }
  0x29   :  { %v65_v38 = vsel %vm61_vm1, %v45_v25, %v48_v33  ;;  %v66_v39 = vsel %vm64_vm2, %v54_v35, 2102212464  ;;  %v69_v40 = vsel %vm61_vm1, %v48_v33, %v51_v34  ;;  %v73_v41 = vsel %vm61_vm1, %v51_v34, %v54_v35 }
  0x2a   :  { %v67_v42 = vsel %vm63_vm4, %v51_v34, %v66_v39  ;;  %v70_v43 = vsel %vm64_vm2, %v57_v36, 920167782  ;;  %v74_v44 = vsel %vm64_vm2, %v60_v37, 1326507024  ;;  %vm135_vm13 = vcmp.lt.s32.totalorder %v133_v26, 256 }
  0x2b   :  { %v71_v45 = vsel %vm63_vm4, %v54_v35, %v70_v43  ;;  %v75_v46 = vsel %vm63_vm4, %v57_v36, %v74_v44  ;;  %v68_v47 = vsel %vm62_vm3, %v65_v38, %v67_v42 }
  0x2c   :  { %v72_v48 = vsel %vm62_vm3, %v69_v40, %v71_v45  ;;  %v76_v49 = vsel %vm62_vm3, %v73_v41, %v75_v46  ;;  %v84_v54 = vmul.u32 %v77_v32, %v68_v47 }
  0x2d   :  { %v257_v50 = vmul.u32.u64.low %v77_v32, %v76_v49  ;;  %v258_v51 = vmul.u32.u64.high %v77_v32, %v76_v49, %v257_v50  ;;  %v260_v52 = vmul.u32.u64.low %v77_v32, %v72_v48  ;;  %v261_v53 = vmul.u32.u64.high %v77_v32, %v72_v48, %v260_v52 }
  0x2f   :  { %vm86_vm5 = vc.u32 %v258_v51, %v260_v52  ;;  %v87_v55 = vadd.s32 1, %v261_v53  ;;  %v85_v2 = vadd.s32 %v260_v52, %v258_v51 }
  0x31   :  { %v88_v56 = vsel %vm86_vm5, %v87_v55, %v261_v53 }
  0x32   :  { %v89_v57 = vadd.s32 %v88_v56, %v84_v54 }
  0x34   :  { %v90_v58 = vadd.s32 536870912, %v89_v57 }
  0x36   :  { %v91_v59 = vshrl.u32 %v90_v58, 30 }
  0x38   :  { %v92_v60 = vshll.u32 %v91_v59, 30  ;;  %v115_v16 = vsub.s32 4, %v91_v59 }
  0x3a   :  { %v93_v61 = vsub.s32 %v89_v57, %v92_v60  ;;  %v116_v19 = vsel %vm31_vm7, %v115_v16, %v91_v59 }
  0x3b   :  { %v118_v22 = vsel %vm30_vm8, 0, %v116_v19 }
  0x3c   :  { %v95_v62 = vsub.s32 0, %v93_v61  ;;  %v122_v23 = vadd.s32 3, %v118_v22 }
  0x3e   :  { %v154_v63 = vmin.u32 %v95_v62, %v93_v61  ;;  %v123_v24 = vand.u32 3, %v122_v23 }
  0x40   :  { %v97_v0 = vclz %v154_v63  ;;  %vm128_vm9 = vcmp.eq.s32.totalorder %v123_v24, 2  ;;  %vm125_vm10 = vcmp.eq.s32.totalorder %v123_v24, 0  ;;  %vm124_vm11 = vcmp.lt.s32.totalorder %v123_v24, 2 }
  0x42   :  { %v155_v1 = vadd.s32 4294967294, %v97_v0 }
  0x44   :  { %vm156_vm6 = vcmp.lt.s32.totalorder %v155_v1, 0 }
  0x45   :  { %v100_v4 = vsel %vm156_vm6, 0, %v155_v1 }
  0x46   :  { %v101_v5 = vsub.s32 32, %v100_v4  ;;  %v102_v7 = vshll.u32 %v93_v61, %v100_v4  ;;  %v105_v8 = vsub.s32 4294967266, %v100_v4 }
  0x48   :  { %v103_v9 = vshrl.u32 %v85_v2, %v101_v5  ;;  %v106_v10 = vadd.s32 127, %v105_v8 }
  0x4a   :  { %v104_v11 = vor.u32 %v103_v9, %v102_v7  ;;  %v107_v12 = vshll.u32 %v106_v10, 23 }
  0x4c   :  { %v108_v13 = vor.u32 4788187, %v107_v12  ;;  %v111_v14 = vcvt.s32.f32 %v104_v11 }
  0x4e   :  { %v109_v15 = vand.u32 2147483647, %v108_v13 }
  0x50   :  { %v112_v17 = vmul.f32 %v111_v14, %v109_v15 }
  0x52   :  { %v113_v18 = vxor.u32 2147483648, %v112_v17 }
  0x54   :  { %v114_v20 = vsel %vm31_vm7, %v113_v18, %v112_v17 }
  0x55   :  { %v117_v21 = vsel %vm30_vm8, %v251_v3, %v114_v20 }
  0x56   :  { %169 = vcosq.f32 %v117_v21 }
  0x57   :  { %171 = vsinq.f32 %v117_v21 }
  0x60   :  { %v170_v25 = vpop.eup %169 }
  0x61   :  { %v172_v27 = vpop.eup %171  ;;  %v129_v28 = vxor.u32 2147483648, %v170_v25 }
  0x62   :  { %v126_v29 = vxor.u32 2147483648, %v172_v27 }
  0x63   :  { %v130_v6 = vsel %vm128_vm9, %v129_v28, %v172_v27 }
  0x64   :  { %v127_v30 = vsel %vm125_vm10, %v170_v25, %v126_v29 }
  0x65   :  { %v131_v31 = vsel %vm124_vm11, %v127_v30, %v130_v6 }
  0x66   :  { %v132_v32 = vsel %vm121_vm12, nan, %v131_v31 }
  0x67   :  { %137 = vst.msk [vmem:[#allocation5] sm:$0x3] %vm135_vm13, %v132_v32 }
  0x68   :  { %206 = shalt.err (!%p203_p12)
}
  0x69   :  { %s207_s22 = scalar_lea.hbm %s285_s1, 32 }
  0x6a   :  { %p208_p13 = scmp.ne.s32.totalorder %s285_s1, %s207_s22  ;;  %p211_p0 = scmp.lt.u32.totalorder %s207_s22, %s285_s1 }
  0x6c   :  { %p213_p1 = pnand %p211_p0, %p208_p13 }
  0x6e   :  { %216 = shalt.err (!%p213_p1)
}
  0x6f   :  { %147 = dma.vmem_to_hbm [thread:$0]  %s145_s18, 32, %s285_s1, [#allocation4]  }
  0x70   :  { %219 = dma.done.wait [#allocation4], 32  }
  0x71   :  { %220 = vsyncadd [#allocation4], 4294967264 }
  0x72   :  { %151 = vsyncpa [#allocation3], 1 }
  0x73   :  { %152 = vsyncpa [#allocation4], 1 }

</bundles_post_ra>
